<compile_context>
chip_gen: v7x
topology: tpu7x:2x2x1
jax: 0.10.0
libtpu: 0.0.40
codegen_flags: <defaults>
</compile_context>

<pallas_src>
import jax
import jax.numpy as jnp
import numpy as np
from jax.experimental import pallas as pl
from jax.experimental.pallas import tpu as pltpu  # noqa: F401  (kept for future tiling/compiler params)


# ----------------------------------------------------------------------------
# Pallas kernel: 3 matmuls + bias adds + relu, all resident in VMEM.
# ----------------------------------------------------------------------------
def gcn_kernel(adj_ref, w1_ref, b1_ref, w2_ref, b2_ref, out_ref):
    adj = adj_ref[...]                                   # (N, N) row-normalized adjacency

    # --- GraphConvolution 1 with identity features: adj @ W1 + b1, then ReLU ---
    h1 = jnp.dot(adj, w1_ref[...], preferred_element_type=jnp.float32) + b1_ref[...]
    h1 = jnp.maximum(h1, 0.0)                            # padded lanes stay exactly 0

    # --- Dropout(p=0.3): eval-mode identity (see TODO above) ---

    # --- GraphConvolution 2: adj @ (h1[:, :D] @ W2) + b2 ---
    # W2's contraction dim is NOT padded; contract only the real D features.
    D = w2_ref.shape[0]
    support2 = jnp.dot(h1[:, :D], w2_ref[...], preferred_element_type=jnp.float32)
    out_ref[...] = (
        jnp.dot(adj, support2, preferred_element_type=jnp.float32) + b2_ref[...]
    )


def gcn_forward(adj_n, w1_p, b1_p, w2_p, b2_p):
    """Single-dispatch forward.  Expects pre-padded params (see pad_gcn_params)
    and returns the lane-dense (N, Dp) padded embedding; padded columns are 0."""
    N = adj_n.shape[0]
    Dp = w1_p.shape[1]
    return pl.pallas_call(
        gcn_kernel,
        out_shape=jax.ShapeDtypeStruct((N, Dp), jnp.float32),
        in_specs=[
            pl.BlockSpec((N, N), lambda: (0, 0)),            # adj
            pl.BlockSpec((N, Dp), lambda: (0, 0)),           # W1 (padded out-axis)
            pl.BlockSpec((1, Dp), lambda: (0, 0)),           # b1 (broadcast over rows)
            pl.BlockSpec(w2_p.shape, lambda: (0, 0)),        # W2 (D, Dp) — unpadded K
            pl.BlockSpec((1, Dp), lambda: (0, 0)),           # b2
        ],
        out_specs=pl.BlockSpec((N, Dp), lambda: (0, 0)),
    )(adj_n, w1_p, b1_p, w2_p, b2_p)


# ----------------------------------------------------------------------------
# One-time init-path helpers (host side, NOT in the per-call path).
# ----------------------------------------------------------------------------
def pad_gcn_params(w1, b1, w2, b2):
    """Zero-pad the feature axis to a lane-dense multiple of 128, ONCE at init.
    W2 is padded only on its output axis (contraction dim stays D)."""
    N, D = w1.shape
    Dp = ((D + 127) // 128) * 128
    w1_p = np.zeros((N, Dp), np.float32); w1_p[:, :D] = np.asarray(w1)
    b1_p = np.zeros((1, Dp), np.float32); b1_p[:, :D] = np.asarray(b1)
    w2_p = np.zeros((D, Dp), np.float32); w2_p[:, :D] = np.asarray(w2)
    b2_p = np.zeros((1, Dp), np.float32); b2_p[:, :D] = np.asarray(b2)
    return (jnp.asarray(w1_p), jnp.asarray(b1_p),
            jnp.asarray(w2_p), jnp.asarray(b2_p), Dp)


def row_normalize(mx):
    """Row-normalize matrix (matches GCN.normalize, with inf -> 0)."""
    rowsum = np.asarray(mx.sum(1)).flatten()
    r_inv = np.power(rowsum, -1.0, where=rowsum != 0)
    r_inv = np.where(rowsum == 0, 0.0, r_inv)
    return r_inv[:, None] * mx


def init_gc_params(key, in_features, out_features):
    """torch GraphConvolution.reset_parameters: U(-stdv, stdv), stdv=1/sqrt(out)."""
    stdv = 1.0 / np.sqrt(out_features)
    kw, kb = jax.random.split(key)
    w = jax.random.uniform(kw, (in_features, out_features), jnp.float32, -stdv, stdv)
    b = jax.random.uniform(kb, (1, out_features), jnp.float32, -stdv, stdv)
    return w, b


if __name__ == "__main__":
    voc_size = 64   # N nodes
    emb_dim = 32    # embedding dimension

    key = jax.random.PRNGKey(0)
    k_adj, k_g1, k_g2 = jax.random.split(key, 3)

    # Deterministic synthetic binary adjacency (symmetric-ish, as in EHR co-occ).
    adj_raw = (jax.random.uniform(k_adj, (voc_size, voc_size)) > 0.8).astype(jnp.float32)
    adj_raw = np.asarray(jnp.maximum(adj_raw, adj_raw.T))

    # GCN.__init__: normalize(adj + I)  (static graph -> host-side, once)
    adj_n = row_normalize(adj_raw + np.eye(voc_size, dtype=np.float32)).astype(np.float32)
    adj_n = jnp.asarray(adj_n)

    # gcn1: (voc_size -> emb_dim), gcn2: (emb_dim -> emb_dim)
    w1, b1 = init_gc_params(k_g1, voc_size, emb_dim)
    w2, b2 = init_gc_params(k_g2, emb_dim, emb_dim)

    # One-time padding at init (perf feedback: out of the per-call path).
    w1_p, b1_p, w2_p, b2_p, Dp = pad_gcn_params(w1, b1, w2, b2)

    # Run the Pallas kernel: one dispatched op per forward, padded output layout.
    out_p = gcn_forward(adj_n, w1_p, b1_p, w2_p, b2_p)
    out_p = jax.block_until_ready(out_p)

    # Pure-JAX reference for sanity (x = eye(voc_size) implicit).
    x = jnp.eye(voc_size, dtype=jnp.float32)
    h1_ref = jnp.maximum(adj_n @ (x @ w1) + b1, 0.0)
    ref = adj_n @ (h1_ref @ w2) + b2

    assert out_p.shape == (voc_size, Dp)
    out = out_p[:, :emb_dim]                       # slice only here, for the check
    np.testing.assert_allclose(np.asarray(out), np.asarray(ref), rtol=1e-5, atol=1e-5)
    # Padded lanes must be exactly zero (inertness invariant).
    np.testing.assert_array_equal(np.asarray(out_p[:, emb_dim:]), 0.0)

    print("KERNEL_OK")
</pallas_src>

<mosaic_0001>
module attributes {stable_mosaic.version = 11 : i64} {
  func.func @gcn_kernel(%arg0: memref<64x64xf32, #tpu.memory_space<vmem>>, %arg1: memref<64x128xf32, #tpu.memory_space<vmem>>, %arg2: memref<1x128xf32, #tpu.memory_space<vmem>>, %arg3: memref<32x128xf32, #tpu.memory_space<vmem>>, %arg4: memref<1x128xf32, #tpu.memory_space<vmem>>, %arg5: memref<64x128xf32, #tpu.memory_space<vmem>>) attributes {dimension_semantics = [], scalar_prefetch = 0 : i64, scratch_operands = 0 : i64, tpu.core_type = #tpu.core_type<tc>} {
    %c0 = arith.constant 0 : index
    %c0_0 = arith.constant 0 : index
    %0 = vector.load %arg0[%c0, %c0_0] : memref<64x64xf32, #tpu.memory_space<vmem>>, vector<64x64xf32>
    %c0_1 = arith.constant 0 : index
    %c0_2 = arith.constant 0 : index
    %1 = vector.load %arg1[%c0_1, %c0_2] : memref<64x128xf32, #tpu.memory_space<vmem>>, vector<64x128xf32>
    %cst = arith.constant dense<0.000000e+00> : vector<64x128xf32>
    %2 = tpu.matmul %0, %1, %cst {dimension_numbers = #tpu.dot_dimension_numbers<[1], [0], [0], [1], [0, 0, 1, 1], [], []>} : vector<64x64xf32>, vector<64x128xf32>, vector<64x128xf32> -> vector<64x128xf32>
    %c0_3 = arith.constant 0 : index
    %c0_4 = arith.constant 0 : index
    %3 = vector.load %arg2[%c0_3, %c0_4] : memref<1x128xf32, #tpu.memory_space<vmem>>, vector<1x128xf32>
    %4 = vector.broadcast %3 : vector<1x128xf32> to vector<64x128xf32>
    %5 = arith.addf %2, %4 : vector<64x128xf32>
    %cst_5 = arith.constant 0.000000e+00 : f32
    %6 = vector.broadcast %cst_5 : f32 to vector<64x128xf32>
    %7 = arith.maximumf %5, %6 : vector<64x128xf32>
    %8 = vector.extract_strided_slice %7 {offsets = [0, 0], sizes = [64, 32], strides = [1, 1]} : vector<64x128xf32> to vector<64x32xf32>
    %c0_6 = arith.constant 0 : index
    %c0_7 = arith.constant 0 : index
    %9 = vector.load %arg3[%c0_6, %c0_7] : memref<32x128xf32, #tpu.memory_space<vmem>>, vector<32x128xf32>
    %cst_8 = arith.constant dense<0.000000e+00> : vector<64x128xf32>
    %10 = tpu.matmul %8, %9, %cst_8 {dimension_numbers = #tpu.dot_dimension_numbers<[1], [0], [0], [1], [0, 0, 1, 1], [], []>} : vector<64x32xf32>, vector<32x128xf32>, vector<64x128xf32> -> vector<64x128xf32>
    %cst_9 = arith.constant dense<0.000000e+00> : vector<64x128xf32>
    %11 = tpu.matmul %0, %10, %cst_9 {dimension_numbers = #tpu.dot_dimension_numbers<[1], [0], [0], [1], [0, 0, 1, 1], [], []>} : vector<64x64xf32>, vector<64x128xf32>, vector<64x128xf32> -> vector<64x128xf32>
    %c0_10 = arith.constant 0 : index
    %c0_11 = arith.constant 0 : index
    %12 = vector.load %arg4[%c0_10, %c0_11] : memref<1x128xf32, #tpu.memory_space<vmem>>, vector<1x128xf32>
    %13 = vector.broadcast %12 : vector<1x128xf32> to vector<64x128xf32>
    %14 = arith.addf %11, %13 : vector<64x128xf32>
    %c0_12 = arith.constant 0 : index
    %c0_13 = arith.constant 0 : index
    %15 = vector.load %arg5[%c0_12, %c0_13] : memref<64x128xf32, #tpu.memory_space<vmem>>, vector<64x128xf32>
    tpu.vector_store %arg5[%c0_12, %c0_13], %14 {strides = array<i32>} : memref<64x128xf32, #tpu.memory_space<vmem>>, vector<64x128xf32>,
    return
  }
}

</mosaic_0001>

<bundles_post_ra>
// kernel: tpu_custom_call.1
= control target key start
LH: loop header
LB: loop body
LE: loop exit
PB: predicated region body
PF: predicated region fallthrough
CT: control target
= control target key end

     0   :  { %10 = vsyncpa [#allocation3], 0  ;;  %s946_s0 = inlined_call_operand.hbm [shape: f32[64,64], index: 0, kind: input, shape index: {}]   ;;  %s947_s1 = inlined_call_operand.hbm [shape: f32[64,128], index: 1, kind: input, shape index: {}]   ;;  %s948_s2 = inlined_call_operand.vmem [shape: f32[1,128], index: 2, kind: input, shape index: {}]   ;;  %s949_s3 = inlined_call_operand.hbm [shape: f32[32,128], index: 3, kind: input, shape index: {}]   ;;  %s950_s4 = inlined_call_operand.vmem [shape: f32[1,128], index: 4, kind: input, shape index: {}]   ;;  %s951_s5 = inlined_call_operand.hbm [shape: f32[64,128], index: 5, kind: output, shape index: {}]  }
   0x1   :  { %11 = vsyncpa [#allocation6], 0 }
   0x2   :  { %12 = vsyncpa [#allocation4], 0  ;;  %s789_s18 = smov [#allocation5]   ;;  %s790_s20 = smov [#allocation2]  }
   0x3   :  { %s30_s19 = sshll.u32 %s789_s18, 4  ;;  %s18_s21 = sshll.u32 %s790_s20, 4  ;;  %s31_s19 = int_to_ptr.vmem [resolvable:$true] %s30_s19  ;;  %s825_s21 = int_to_ptr.vmem [resolvable:$true] %s18_s21 }
   0x4   :  { %s695_s24 = scalar_lea.hbm %s947_s1, 1024 }
   0x5   :  { %p696_p0 = scmp.ne.s32.totalorder %s947_s1, %s695_s24  ;;  %p699_p1 = scmp.lt.u32.totalorder %s695_s24, %s947_s1 }
   0x7   :  { %p701_p2 = pnand %p699_p1, %p696_p0 }
   0x9   :  { %704 = shalt.err (!%p701_p2)
}
   0xa   :  { %s705_s29 = scalar_lea.vmem %s31_s19, 1024  ;;  %p710_p4 = scmp.lt.s32.totalorder %s31_s19, %s31_s19 }
   0xb   :  { %p706_p3 = scmp.ne.s32.totalorder %s31_s19, %s705_s29  ;;  %p711_p5 = scmp.lt.s32.totalorder %s705_s29, %s705_s29 }
   0xd   :  { %p712_p6 = por %p711_p5, %p710_p4 }
   0xf   :  { %p713_p7 = pnand %p712_p6, %p706_p3 }
  0x11   :  { %716 = shalt.err (!%p713_p7)
}
  0x12   :  { %s791_s30 = smov 128   ;;  %s792_s6 = smov 8  }
  0x13   :  { %36 = dma.hbm_to_vmem [thread:$0]  %s947_s1, 1024, %s31_s19, [#allocation6], %s791_s30, %s791_s30, %s792_s6  }
  0x14   :  { %s717_s11 = scalar_lea.hbm %s946_s0, 1024 }
  0x15   :  { %p718_p8 = scmp.ne.s32.totalorder %s946_s0, %s717_s11  ;;  %p721_p9 = scmp.lt.u32.totalorder %s717_s11, %s946_s0 }
  0x17   :  { %p723_p10 = pnand %p721_p9, %p718_p8 }
  0x19   :  { %726 = shalt.err (!%p723_p10)
}
  0x1a   :  { %s727_s16 = scalar_lea.vmem %s825_s21, 1024  ;;  %p732_p12 = scmp.lt.s32.totalorder %s825_s21, %s825_s21 }
  0x1b   :  { %p728_p11 = scmp.ne.s32.totalorder %s825_s21, %s727_s16  ;;  %p733_p13 = scmp.lt.s32.totalorder %s727_s16, %s727_s16 }
  0x1d   :  { %p734_p0 = por %p733_p13, %p732_p12 }
  0x1f   :  { %p735_p1 = pnand %p734_p0, %p728_p11 }
  0x21   :  { %738 = shalt.err (!%p735_p1)
}
  0x22   :  { %24 = dma.hbm_to_vmem [thread:$0]  %s946_s0, 1024, %s825_s21, [#allocation3], %s791_s30, %s791_s30, %s792_s6  }
  0x23   :  { %s793_s18 = smov [#allocation7]   ;;  %s739_s23 = scalar_lea.hbm %s949_s3, 512 }
  0x24   :  { %s44_s19 = sshll.u32 %s793_s18, 4  ;;  %p740_p2 = scmp.ne.s32.totalorder %s949_s3, %s739_s23  ;;  %s45_s19 = int_to_ptr.vmem [resolvable:$true] %s44_s19 }
  0x25   :  { %p743_p3 = scmp.lt.u32.totalorder %s739_s23, %s949_s3 }
  0x27   :  { %p745_p4 = pnand %p743_p3, %p740_p2 }
  0x29   :  { %748 = shalt.err (!%p745_p4)
}
  0x2a   :  { %s749_s28 = scalar_lea.vmem %s45_s19, 512  ;;  %p754_p6 = scmp.lt.s32.totalorder %s45_s19, %s45_s19 }
  0x2b   :  { %p750_p5 = scmp.ne.s32.totalorder %s45_s19, %s749_s28  ;;  %p755_p7 = scmp.lt.s32.totalorder %s749_s28, %s749_s28 }
  0x2d   :  { %p756_p8 = por %p755_p7, %p754_p6 }
  0x2f   :  { %p757_p9 = pnand %p756_p8, %p750_p5 }
  0x31   :  { %760 = shalt.err (!%p757_p9)
}
  0x32   :  { %50 = dma.hbm_to_vmem [thread:$0]  %s949_s3, 512, %s45_s19, [#allocation6], %s791_s30, %s791_s30, %s792_s6  }
  0x33   :  { %783 = dma.done.wait [#allocation3], 1024  }
  0x34   :  { %784 = vsyncadd [#allocation3], 4294966272 }
  0x35   :  { %785 = dma.done.wait [#allocation6], 1536  }
  0x36   :  { %786 = vsyncadd [#allocation6], 4294965760  ;;  %v70_v0 = vld [vmem:[#allocation5] sm:$0xff]  ;;  %v71_v1 = vld [vmem:[#allocation5 + $0x8] sm:$0xff]  ;;  %vm85_vm0 = vcmask 523264   ;;  %vm227_vm1 = vcmask 261120  }
  0x37   :  { %v72_v2 = vld [vmem:[#allocation5 + $0x10] sm:$0xff]  ;;  %v641_v3 = vpack.c.bf16 %v71_v1, %v70_v0  ;;  %v73_v4 = vld [vmem:[#allocation5 + $0x18] sm:$0xff]  ;;  %v74_v6 = vld [vmem:[#allocation5 + $0x20] sm:$0xff]  ;;  %s794_s8 = smov [#allocation8]  }
  0x38   :  { %v645_v5 = vpack.c.bf16 %v73_v4, %v72_v2  ;;  %v75_v7 = vld [vmem:[#allocation5 + $0x28] sm:$0xff]  ;;  %v62_v8 = vld [vmem:[#allocation2] sm:$0xff]  ;;  %v76_v12 = vld [vmem:[#allocation5 + $0x30] sm:$0xff]  ;;  %s482_s9 = sshll.u32 %s794_s8, 4  ;;  %s483_s9 = int_to_ptr.vmem [resolvable:$true] %s482_s9 }
  0x39   :  { %642 = vmatprep.subr.bf16.mxu0 %v641_v3  ;;  %581 = vmatprep.mubr.msk.f32.mxu0 %vm85_vm0, %v62_v8  ;;  %v649_v9 = vpack.c.bf16 %v75_v7, %v74_v6  ;;  %v223_v10 = vld [vmem:[#allocation7] sm:$0xff]  ;;  %v224_v11 = vld [vmem:[#allocation7 + $0x8] sm:$0xff]  ;;  %v77_v13 = vld [vmem:[#allocation5 + $0x38] sm:$0xff]  ;;  %p766_p11 = scmp.lt.s32.totalorder %s483_s9, %s483_s9 }
  0x3a   :  { %644 = vmatpush3.bf16.msra.mxu0 %v641_v3  ;;  %v657_v14 = vpack.c.bf16 %v224_v11, %v223_v10  ;;  %v653_v15 = vpack.c.bf16 %v77_v13, %v76_v12  ;;  %v878_v16 = vld [vmem:[#allocation2 + $0x8] sm:$0xff]  ;;  %v64_v17 = vld [vmem:[#allocation2 + $0x10] sm:$0xff]  ;;  %v883_v18 = vld [vmem:[#allocation2 + $0x18] sm:$0xff] }
  0x3b   :  { %646 = vmatprep.subr.bf16.mxu0 %v645_v5  ;;  %v885_v19 = vld [vmem:[#allocation2 + $0x20] sm:$0xff]  ;;  %v891_v20 = vld [vmem:[#allocation2 + $0x28] sm:$0xff]  ;;  %v893_v21 = vld [vmem:[#allocation2 + $0x30] sm:$0xff] }
  0x3c   :  { %658 = vmatprep.subr.bf16.mxu1 %v657_v14  ;;  %v899_v22 = vld [vmem:[#allocation2 + $0x38] sm:$0xff]  ;;  %v225_v23 = vld [vmem:[#allocation7 + $0x10] sm:$0xff]  ;;  %v495_v26 = vld [vmem:[%s948_s2] ss:$0 sm:$0xff] }
  0x3d   :  { %660 = vmatpush3.bf16.msra.mxu1 %v657_v14  ;;  %v226_v24 = vld [vmem:[#allocation7 + $0x18] sm:$0xff]  ;;  %v512_v63 = vld [vmem:[%s950_s4] ss:$0 sm:$0xff]  ;;  %s761_s4 = scalar_lea.vmem %s483_s9, 1024 }
  0x3e   :  { %648 = vmatpush3.bf16.msra.mxu0 %v645_v5  ;;  %v661_v25 = vpack.c.bf16 %v226_v24, %v225_v23  ;;  %p762_p10 = scmp.ne.s32.totalorder %s483_s9, %s761_s4  ;;  %p767_p12 = scmp.lt.s32.totalorder %s761_s4, %s761_s4 }
  0x3f   :  { %650 = vmatprep.subr.bf16.mxu0 %v649_v9 }
  0x40   :  { %662 = vmatprep.subr.bf16.mxu1 %v661_v25  ;;  %p768_p13 = por %p767_p12, %p766_p11 }
  0x41   :  { %664 = vmatpush3.bf16.msra.mxu1 %v661_v25 }
  0x42   :  { %652 = vmatpush3.bf16.msra.mxu0 %v649_v9  ;;  %p769_p0 = pnand %p768_p13, %p762_p10 }
  0x43   :  { %654 = vmatprep.subr.bf16.mxu0 %v653_v15 }
  0x46   :  { %656 = vmatpush3.bf16.msra.mxu0 %v653_v15 }
  0x49   :  { %582 = vmatmul.mubr.msk.f32.vlgmr.msra.gmra.mrb[0].mxu0 %vm85_vm0, %v878_v16 }
  0x4a   :  { %584 = vmatprep.mubr.msk.f32.mxu0 %vm85_vm0, %v64_v17 }
  0x4d   :  { %585 = vmatmul.mubr.msk.f32.gmra.mrb[2].mxu0 %vm85_vm0, %v883_v18 }
  0x4e   :  { %587 = vmatprep.mubr.msk.f32.mxu0 %vm85_vm0, %v885_v19 }
  0x51   :  { %588 = vmatmul.mubr.msk.f32.gmra.mrb[4].mxu0 %vm85_vm0, %v891_v20 }
  0x52   :  { %590 = vmatprep.mubr.msk.f32.mxu0 %vm85_vm0, %v893_v21 }
  0x55   :  { %591 = vmatmul.mubr.msk.f32.gmra.mrb[6].mxu0 %vm85_vm0, %v899_v22 }
  0x56   :  { %629 = vmatprep.mubr.msk.f32.mxu0 %vm85_vm0, %v62_v8 }
 0x11c   :  { %v583_v27 = vpop.f32.mrb[0].mxu0 }
 0x11d   :  { %v182_v28 = vadd.f32 %v583_v27, %v495_v26  ;;  %v176_v29 = vpop.f32.mrb[1].mxu0 }
 0x11e   :  { %v177_v30 = vadd.f32 %v495_v26, %v176_v29 }
 0x11f   :  { %v216_v33 = vmax.f32 %v182_v28, 0.0 }
 0x120   :  { %v215_v31 = vmax.f32 %v177_v30, 0.0  ;;  %v586_v32 = vpop.f32.mrb[2].mxu0 }
 0x121   :  { %v192_v34 = vadd.f32 %v586_v32, %v495_v26  ;;  %v186_v35 = vpop.f32.mrb[3].mxu0 }
 0x122   :  { %v187_v36 = vadd.f32 %v495_v26, %v186_v35  ;;  %601 = vmatprep.mubr.msk.f32.mxu1 %vm227_vm1, %v215_v31 }
 0x123   :  { %602 = vmatmul.mubr.msk.f32.vlgmr.msra.gmra.mrb[0].mxu1 %vm227_vm1, %v216_v33  ;;  %v218_v39 = vmax.f32 %v192_v34, 0.0 }
 0x124   :  { %v217_v37 = vmax.f32 %v187_v36, 0.0  ;;  %v589_v38 = vpop.f32.mrb[4].mxu0 }
 0x125   :  { %v202_v40 = vadd.f32 %v589_v38, %v495_v26  ;;  %v196_v41 = vpop.f32.mrb[5].mxu0 }
 0x126   :  { %v197_v42 = vadd.f32 %v495_v26, %v196_v41  ;;  %604 = vmatprep.mubr.msk.f32.mxu1 %vm227_vm1, %v217_v37 }
 0x127   :  { %605 = vmatmul.mubr.msk.f32.gmra.mrb[2].mxu1 %vm227_vm1, %v218_v39  ;;  %v220_v45 = vmax.f32 %v202_v40, 0.0 }
 0x128   :  { %v219_v43 = vmax.f32 %v197_v42, 0.0  ;;  %v592_v44 = vpop.f32.mrb[6].mxu0 }
 0x129   :  { %v212_v46 = vadd.f32 %v592_v44, %v495_v26  ;;  %v206_v47 = vpop.f32.mrb[7].mxu0 }
 0x12a   :  { %v207_v48 = vadd.f32 %v495_v26, %v206_v47  ;;  %607 = vmatprep.mubr.msk.f32.mxu1 %vm227_vm1, %v219_v43 }
 0x12b   :  { %608 = vmatmul.mubr.msk.f32.gmra.mrb[4].mxu1 %vm227_vm1, %v220_v45  ;;  %v222_v50 = vmax.f32 %v212_v46, 0.0 }
 0x12c   :  { %v221_v49 = vmax.f32 %v207_v48, 0.0 }
 0x12e   :  { %610 = vmatprep.mubr.msk.f32.mxu1 %vm227_vm1, %v221_v49 }
 0x12f   :  { %611 = vmatmul.mubr.msk.f32.gmra.mrb[6].mxu1 %vm227_vm1, %v222_v50 }
 0x130   :  { %632 = vmatprep.mubr.msk.f32.mxu1 %vm85_vm0, %v64_v17 }
 0x1f6   :  { %v603_v51 = vpop.f32.mrb[0].mxu1 }
 0x1f7   :  { %v318_v52 = vpop.f32.mrb[1].mxu1 }
 0x1f8   :  { %v665_v53 = vpack.c.bf16 %v603_v51, %v318_v52 }
 0x1fa   :  { %v606_v54 = vpop.f32.mrb[2].mxu1  ;;  %666 = vmatprep.subr.bf16.mxu0 %v665_v53  ;;  %681 = vmatprep.subr.bf16.mxu1 %v665_v53 }
 0x1fb   :  { %v328_v55 = vpop.f32.mrb[3].mxu1  ;;  %668 = vmatpush3.bf16.msra.mxu0 %v665_v53  ;;  %685 = vmatpush3.bf16.msra.mxu1 %v665_v53 }
 0x1fc   :  { %v669_v56 = vpack.c.bf16 %v606_v54, %v328_v55 }
 0x1fe   :  { %v609_v57 = vpop.f32.mrb[4].mxu1  ;;  %670 = vmatprep.subr.bf16.mxu0 %v669_v56  ;;  %682 = vmatprep.subr.bf16.mxu1 %v669_v56 }
 0x1ff   :  { %v338_v58 = vpop.f32.mrb[5].mxu1  ;;  %672 = vmatpush3.bf16.msra.mxu0 %v669_v56  ;;  %686 = vmatpush3.bf16.msra.mxu1 %v669_v56 }
 0x200   :  { %v673_v59 = vpack.c.bf16 %v609_v57, %v338_v58 }
 0x202   :  { %v612_v60 = vpop.f32.mrb[6].mxu1  ;;  %674 = vmatprep.subr.bf16.mxu0 %v673_v59  ;;  %683 = vmatprep.subr.bf16.mxu1 %v673_v59 }
 0x203   :  { %v348_v61 = vpop.f32.mrb[7].mxu1  ;;  %676 = vmatpush3.bf16.msra.mxu0 %v673_v59  ;;  %687 = vmatpush3.bf16.msra.mxu1 %v673_v59 }
 0x204   :  { %v677_v62 = vpack.c.bf16 %v612_v60, %v348_v61 }
 0x206   :  { %678 = vmatprep.subr.bf16.mxu0 %v677_v62  ;;  %684 = vmatprep.subr.bf16.mxu1 %v677_v62 }
 0x207   :  { %680 = vmatpush3.bf16.msra.mxu0 %v677_v62  ;;  %688 = vmatpush3.bf16.msra.mxu1 %v677_v62 }
 0x20a   :  { %633 = vmatmul.mubr.msk.f32.vlgmr.msra.gmra.mrb[8].mxu1 %vm85_vm0, %v883_v18  ;;  %630 = vmatmul.mubr.msk.f32.vlgmr.msra.gmra.mrb[8].mxu0 %vm85_vm0, %v878_v16 }
 0x20b   :  { %635 = vmatprep.mubr.msk.f32.mxu1 %vm85_vm0, %v885_v19 }
 0x20e   :  { %636 = vmatmul.mubr.msk.f32.gmra.mrb[10].mxu1 %vm85_vm0, %v891_v20 }
 0x20f   :  { %638 = vmatprep.mubr.msk.f32.mxu1 %vm85_vm0, %v893_v21 }
 0x212   :  { %639 = vmatmul.mubr.msk.f32.gmra.mrb[12].mxu1 %vm85_vm0, %v899_v22 }
 0x2dd   :  { %v634_v0 = vpop.f32.mrb[8].mxu1  ;;  %v631_v1 = vpop.f32.mrb[8].mxu0 }
 0x2de   :  { %v446_v2 = vadd.f32 %v634_v0, %v512_v63  ;;  %v440_v3 = vpop.f32.mrb[9].mxu1  ;;  %v436_v4 = vadd.f32 %v631_v1, %v512_v63  ;;  %v430_v5 = vpop.f32.mrb[9].mxu0 }
 0x2df   :  { %v441_v6 = vadd.f32 %v512_v63, %v440_v3  ;;  %v431_v7 = vadd.f32 %v512_v63, %v430_v5 }
 0x2e0   :  { %472 = vst [vmem:[#allocation8 + $0x18] sm:$0xff] %v446_v2  ;;  %470 = vst [vmem:[#allocation8 + $0x8] sm:$0xff] %v436_v4 }
 0x2e1   :  { %471 = vst [vmem:[#allocation8 + $0x10] sm:$0xff] %v441_v6  ;;  %v637_v8 = vpop.f32.mrb[10].mxu1  ;;  %469 = vst [vmem:[#allocation8] sm:$0xff] %v431_v7 }
 0x2e2   :  { %v456_v9 = vadd.f32 %v637_v8, %v512_v63  ;;  %v450_v10 = vpop.f32.mrb[11].mxu1 }
 0x2e3   :  { %v451_v11 = vadd.f32 %v512_v63, %v450_v10 }
 0x2e4   :  { %474 = vst [vmem:[#allocation8 + $0x28] sm:$0xff] %v456_v9 }
 0x2e5   :  { %473 = vst [vmem:[#allocation8 + $0x20] sm:$0xff] %v451_v11  ;;  %v640_v12 = vpop.f32.mrb[12].mxu1 }
 0x2e6   :  { %v466_v13 = vadd.f32 %v640_v12, %v512_v63  ;;  %v460_v14 = vpop.f32.mrb[13].mxu1 }
 0x2e7   :  { %v461_v15 = vadd.f32 %v512_v63, %v460_v14 }
 0x2e8   :  { %476 = vst [vmem:[#allocation8 + $0x38] sm:$0xff] %v466_v13 }
 0x2e9   :  { %475 = vst [vmem:[#allocation8 + $0x30] sm:$0xff] %v461_v15 }
 0x2ea   :  { %772 = shalt.err (!%p769_p0)
}
 0x2eb   :  { %s773_s12 = scalar_lea.hbm %s951_s5, 1024 }
 0x2ec   :  { %p774_p1 = scmp.ne.s32.totalorder %s951_s5, %s773_s12  ;;  %p777_p2 = scmp.lt.u32.totalorder %s773_s12, %s951_s5 }
 0x2ee   :  { %p779_p3 = pnand %p777_p2, %p774_p1 }
 0x2f0   :  { %782 = shalt.err (!%p779_p3)
}
 0x2f1   :  { %488 = dma.vmem_to_hbm [thread:$0]  %s483_s9, 1024, %s951_s5, [#allocation4], %s791_s30, %s791_s30, %s792_s6  }
 0x2f2   :  { %787 = dma.done.wait [#allocation4], 1024  }
 0x2f3   :  { %788 = vsyncadd [#allocation4], 4294966272 }
 0x2f4   :  { %492 = vsyncpa [#allocation3], 1 }
 0x2f5   :  { %493 = vsyncpa [#allocation6], 1 }
 0x2f6   :  { %494 = vsyncpa [#allocation4], 1 }

</bundles_post_ra>
